<compile_context>
chip_gen: v7x
topology: tpu7x:2x2x1
jax: 0.10.0
libtpu: 0.0.40
codegen_flags: <defaults>
</compile_context>

<pallas_src>
import math

import jax
import jax.numpy as jnp
from jax import lax
from jax.experimental import pallas as pl
from jax.experimental.pallas import tpu as pltpu

_EPS = 1e-8
_LANE = 512    # lane width of a slab row (multiple of 128)
_SUB = 16      # sublane depth (multiple of 8 for f32, 16 for packed bf16)
_TM_MAX = 128  # major rows per block -> 128*16*512*4B = 4 MiB per f32 block


def _dice_partials(pred3, targ3):
    """pred3/targ3: (R, _SUB, _LANE) contiguous slabs in native dtype.

    Returns two f32 arrays of shape (_SUB, _LANE): vector partial sums of
    sigmoid(p)*t and sigmoid(p)+t over all R*_SUB*_LANE elements.
    """
    r = pred3.shape[0]
    tm = min(_TM_MAX, r)
    num_blocks = pl.cdiv(r, tm)
    tail_rows = r % tm          # 0 => every block is fully in-bounds

    def kernel(p_ref, t_ref, inter_ref, union_ref, inter_acc, union_acc):
        j = pl.program_id(0)
        last = pl.num_programs(0) - 1

        @pl.when(j == 0)
        def _init():
            inter_acc[...] = jnp.zeros_like(inter_acc)
            union_acc[...] = jnp.zeros_like(union_acc)

        def make_body(masked):
            def body(i, carry):
                ic, uc = carry
                # Row-at-a-time load keeps the working set in vregs and fuses
                # sigmoid/mul/add into the (16, 512) carries (pure VPU/EUP).
                p = jax.nn.sigmoid(p_ref[i].astype(jnp.float32))
                t = t_ref[i].astype(jnp.float32)
                if masked:
                    # Select (not multiply) so garbage/NaN in the OOB rows of
                    # a partial last block can never leak into the sums.
                    valid = (j * tm + i) < r
                    zeros = jnp.zeros_like(p)
                    p = jnp.where(valid, p, zeros)
                    t = jnp.where(valid, t, zeros)
                return ic + p * t, uc + (p + t)
            return body

        def run(masked):
            z = jnp.zeros((_SUB, _LANE), jnp.float32)
            ic, uc = lax.fori_loop(0, tm, make_body(masked), (z, z),
                                   unroll=min(8, tm))
            inter_acc[...] += ic
            union_acc[...] += uc

        if tail_rows == 0:
            run(False)
        else:
            @pl.when(j < last)
            def _full_blocks():
                run(False)

            @pl.when(j == last)
            def _partial_block():
                run(True)

        @pl.when(j == last)
        def _write_out():
            inter_ref[...] = inter_acc[...]
            union_ref[...] = union_acc[...]

    out_shape = (
        jax.ShapeDtypeStruct((_SUB, _LANE), jnp.float32),
        jax.ShapeDtypeStruct((_SUB, _LANE), jnp.float32),
    )
    grid_spec = pltpu.PrefetchScalarGridSpec(
        num_scalar_prefetch=0,
        grid=(num_blocks,),
        in_specs=[
            pl.BlockSpec((tm, _SUB, _LANE), lambda j: (j, 0, 0)),
            pl.BlockSpec((tm, _SUB, _LANE), lambda j: (j, 0, 0)),
        ],
        out_specs=[
            pl.BlockSpec((_SUB, _LANE), lambda j: (0, 0)),
            pl.BlockSpec((_SUB, _LANE), lambda j: (0, 0)),
        ],
        scratch_shapes=[
            pltpu.VMEM((_SUB, _LANE), jnp.float32),
            pltpu.VMEM((_SUB, _LANE), jnp.float32),
        ],
    )
    return pl.pallas_call(
        kernel,
        out_shape=out_shape,
        grid_spec=grid_spec,
        compiler_params=pltpu.CompilerParams(
            dimension_semantics=("arbitrary",),
            vmem_limit_bytes=48 * 1024 * 1024,
        ),
    )(pred3, targ3)


def _jnp_partial_sums(p, t):
    """Plain-jnp partial sums (used for tiny inputs and the ragged tail)."""
    p32 = jax.nn.sigmoid(p.astype(jnp.float32))
    t32 = t.astype(jnp.float32)
    return jnp.sum(p32 * t32), jnp.sum(p32 + t32)


@jax.jit
def dice_loss(predict, target):
    assert predict.shape == target.shape, "the size of predict and target must be equal."

    total = math.prod(predict.shape)
    # Flatten row-major (same element order as torch .view(num, -1) followed
    # by the global .sum()).  Dtype stays native; the kernel casts on-chip.
    p_flat = predict.reshape(-1)
    t_flat = target.reshape(-1)

    slab = _SUB * _LANE           # 8192 elements per (16, 512) slab
    r = total // slab
    rem = total - r * slab

    if r == 0:
        # Too small for even one slab: the pallas_call fixed cost would
        # dominate, and XLA fuses the naive path perfectly at this scale.
        inter, union = _jnp_partial_sums(p_flat, t_flat)
    else:
        if rem == 0:
            p_main, t_main = p_flat, t_flat          # reshape below is free
            inter_tail = jnp.float32(0.0)
            union_tail = jnp.float32(0.0)
        else:
            main = r * slab
            p_main = p_flat[:main]
            t_main = t_flat[:main]
            inter_tail, union_tail = _jnp_partial_sums(p_flat[main:], t_flat[main:])

        pred3 = p_main.reshape(r, _SUB, _LANE)
        targ3 = t_main.reshape(r, _SUB, _LANE)
        inter_v, union_v = _dice_partials(pred3, targ3)
        inter = jnp.sum(inter_v) + inter_tail
        union = jnp.sum(union_v) + union_tail

    return 1.0 - 2.0 * (inter + _EPS) / (union + _EPS)


def _dice_loss_ref(predict, target):
    num = predict.shape[0]
    pre = jax.nn.sigmoid(predict.astype(jnp.float32)).reshape(num, -1)
    tar = target.astype(jnp.float32).reshape(num, -1)
    inter = jnp.sum(jnp.sum(pre * tar, axis=-1))
    union = jnp.sum(jnp.sum(pre + tar, axis=-1))
    return 1.0 - 2.0 * (inter + _EPS) / (union + _EPS)


if __name__ == "__main__":
    key = jax.random.PRNGKey(0)
    k1, k2, k3, k4, k5, k6 = jax.random.split(key, 6)

    # 1) Aligned case (exercises the Pallas kernel, zero-copy reshape):
    #    2*4*32*32 = 8192 elements = exactly one (16, 512) slab.
    predict = jax.random.normal(k1, (2, 4, 32, 32), dtype=jnp.float32)
    target = (jax.random.uniform(k2, (2, 4, 32, 32)) > 0.5).astype(jnp.float32)
    score = dice_loss(predict, target)
    jax.block_until_ready(score)
    ref = _dice_loss_ref(predict, target)
    assert jnp.allclose(score, ref, atol=1e-5, rtol=1e-5), (score, ref)

    # 2) Ragged case: 2*4*33*33 = 8712 -> one slab via the kernel + 520-element
    #    jnp tail in the wrapper (no pad copy).
    predict2 = jax.random.normal(k3, (2, 4, 33, 33), dtype=jnp.float32)
    target2 = (jax.random.uniform(k4, (2, 4, 33, 33)) > 0.5).astype(jnp.float32)
    score2 = dice_loss(predict2, target2)
    jax.block_until_ready(score2)
    ref2 = _dice_loss_ref(predict2, target2)
    assert jnp.allclose(score2, ref2, atol=1e-5, rtol=1e-5), (score2, ref2)

    # 3) Tiny case (small-input fallback path): 2*4*16*16 = 2048 elements.
    predict3 = jax.random.normal(k5, (2, 4, 16, 16), dtype=jnp.float32)
    target3 = (jax.random.uniform(k6, (2, 4, 16, 16)) > 0.5).astype(jnp.float32)
    score3 = dice_loss(predict3, target3)
    jax.block_until_ready(score3)
    ref3 = _dice_loss_ref(predict3, target3)
    assert jnp.allclose(score3, ref3, atol=1e-5, rtol=1e-5), (score3, ref3)

    print("KERNEL_OK")
</pallas_src>

<mosaic_0001>
module attributes {stable_mosaic.version = 11 : i64} {
  func.func @kernel(%arg0: i32, %arg1: memref<1x16x512xf32, #tpu.memory_space<vmem>>, %arg2: memref<1x16x512xf32, #tpu.memory_space<vmem>>, %arg3: memref<16x512xf32, #tpu.memory_space<vmem>>, %arg4: memref<16x512xf32, #tpu.memory_space<vmem>>, %arg5: memref<16x512xf32, #tpu.memory_space<vmem>>, %arg6: memref<16x512xf32, #tpu.memory_space<vmem>>) attributes {dimension_semantics = [#tpu.dimension_semantics<arbitrary>], iteration_bounds = array<i64: 1>, scalar_prefetch = 0 : i64, scratch_operands = 2 : i64, tpu.core_type = #tpu.core_type<tc>, window_params = [{transform_indices = @transform_0, window_bounds = array<i64: 1, 16, 512>}, {transform_indices = @transform_1, window_bounds = array<i64: 1, 16, 512>}, {pipeline_mode = #tpu.pipeline_mode<synchronous>, transform_indices = @transform_2, window_bounds = array<i64: 16, 512>}, {pipeline_mode = #tpu.pipeline_mode<synchronous>, transform_indices = @transform_3, window_bounds = array<i64: 16, 512>}]} {
    %c0_i32 = arith.constant 0 : i32
    %0 = arith.cmpi eq, %arg0, %c0_i32 : i32
    %1 = arith.extui %0 : i1 to i32
    %c0_i32_0 = arith.constant 0 : i32
    %2 = arith.cmpi ne, %1, %c0_i32_0 : i32
    scf.if %2 {
      %cst_16 = arith.constant 0.000000e+00 : f32
      %28 = vector.broadcast %cst_16 : f32 to vector<16x512xf32>
      %c0_17 = arith.constant 0 : index
      %c0_18 = arith.constant 0 : index
      %29 = vector.load %arg5[%c0_17, %c0_18] : memref<16x512xf32, #tpu.memory_space<vmem>>, vector<16x512xf32>
      tpu.vector_store %arg5[%c0_17, %c0_18], %28 {strides = array<i32>} : memref<16x512xf32, #tpu.memory_space<vmem>>, vector<16x512xf32>,
      %cst_19 = arith.constant 0.000000e+00 : f32
      %30 = vector.broadcast %cst_19 : f32 to vector<16x512xf32>
      %c0_20 = arith.constant 0 : index
      %c0_21 = arith.constant 0 : index
      %31 = vector.load %arg6[%c0_20, %c0_21] : memref<16x512xf32, #tpu.memory_space<vmem>>, vector<16x512xf32>
      tpu.vector_store %arg6[%c0_20, %c0_21], %30 {strides = array<i32>} : memref<16x512xf32, #tpu.memory_space<vmem>>, vector<16x512xf32>,
    } else {
    }
    %cst = arith.constant 0.000000e+00 : f32
    %3 = vector.broadcast %cst : f32 to vector<16x512xf32>
    %c0_i32_1 = arith.constant 0 : i32
    %4 = arith.index_cast %c0_i32_1 : i32 to index
    %c0 = arith.constant 0 : index
    %c0_2 = arith.constant 0 : index
    %5 = vector.load %arg1[%4, %c0, %c0_2] : memref<1x16x512xf32, #tpu.memory_space<vmem>>, vector<1x16x512xf32>
    %6 = vector.shape_cast %5 : vector<1x16x512xf32> to vector<16x512xf32>
    %7 = arith.negf %6 : vector<16x512xf32>
    %8 = math.exp %7 : vector<16x512xf32>
    %cst_3 = arith.constant 1.000000e+00 : f32
    %9 = vector.broadcast %cst_3 : f32 to vector<16x512xf32>
    %10 = arith.addf %9, %8 : vector<16x512xf32>
    %11 = arith.divf %9, %10 : vector<16x512xf32>
    %12 = arith.index_cast %c0_i32_1 : i32 to index
    %c0_4 = arith.constant 0 : index
    %c0_5 = arith.constant 0 : index
    %13 = vector.load %arg2[%12, %c0_4, %c0_5] : memref<1x16x512xf32, #tpu.memory_space<vmem>>, vector<1x16x512xf32>
    %14 = vector.shape_cast %13 : vector<1x16x512xf32> to vector<16x512xf32>
    %15 = arith.mulf %11, %14 : vector<16x512xf32>
    %16 = arith.addf %3, %15 : vector<16x512xf32>
    %17 = arith.addf %11, %14 : vector<16x512xf32>
    %18 = arith.addf %3, %17 : vector<16x512xf32>
    %c1_i32 = arith.constant 1 : i32
    %c0_6 = arith.constant 0 : index
    %c0_7 = arith.constant 0 : index
    %19 = vector.load %arg5[%c0_6, %c0_7] : memref<16x512xf32, #tpu.memory_space<vmem>>, vector<16x512xf32>
    %20 = arith.addf %19, %16 : vector<16x512xf32>
    %c0_8 = arith.constant 0 : index
    %c0_9 = arith.constant 0 : index
    %21 = vector.load %arg5[%c0_8, %c0_9] : memref<16x512xf32, #tpu.memory_space<vmem>>, vector<16x512xf32>
    tpu.vector_store %arg5[%c0_8, %c0_9], %20 {strides = array<i32>} : memref<16x512xf32, #tpu.memory_space<vmem>>, vector<16x512xf32>,
    %c0_10 = arith.constant 0 : index
    %c0_11 = arith.constant 0 : index
    %22 = vector.load %arg6[%c0_10, %c0_11] : memref<16x512xf32, #tpu.memory_space<vmem>>, vector<16x512xf32>
    %23 = arith.addf %22, %18 : vector<16x512xf32>
    %c0_12 = arith.constant 0 : index
    %c0_13 = arith.constant 0 : index
    %24 = vector.load %arg6[%c0_12, %c0_13] : memref<16x512xf32, #tpu.memory_space<vmem>>, vector<16x512xf32>
    tpu.vector_store %arg6[%c0_12, %c0_13], %23 {strides = array<i32>} : memref<16x512xf32, #tpu.memory_space<vmem>>, vector<16x512xf32>,
    %c0_i32_14 = arith.constant 0 : i32
    %25 = arith.cmpi eq, %arg0, %c0_i32_14 : i32
    %26 = arith.extui %25 : i1 to i32
    %c0_i32_15 = arith.constant 0 : i32
    %27 = arith.cmpi ne, %26, %c0_i32_15 : i32
    scf.if %27 {
      %c0_16 = arith.constant 0 : index
      %c0_17 = arith.constant 0 : index
      %28 = vector.load %arg5[%c0_16, %c0_17] : memref<16x512xf32, #tpu.memory_space<vmem>>, vector<16x512xf32>
      %c0_18 = arith.constant 0 : index
      %c0_19 = arith.constant 0 : index
      %29 = vector.load %arg3[%c0_18, %c0_19] : memref<16x512xf32, #tpu.memory_space<vmem>>, vector<16x512xf32>
      tpu.vector_store %arg3[%c0_18, %c0_19], %28 {strides = array<i32>} : memref<16x512xf32, #tpu.memory_space<vmem>>, vector<16x512xf32>,
      %c0_20 = arith.constant 0 : index
      %c0_21 = arith.constant 0 : index
      %30 = vector.load %arg6[%c0_20, %c0_21] : memref<16x512xf32, #tpu.memory_space<vmem>>, vector<16x512xf32>
      %c0_22 = arith.constant 0 : index
      %c0_23 = arith.constant 0 : index
      %31 = vector.load %arg4[%c0_22, %c0_23] : memref<16x512xf32, #tpu.memory_space<vmem>>, vector<16x512xf32>
      tpu.vector_store %arg4[%c0_22, %c0_23], %30 {strides = array<i32>} : memref<16x512xf32, #tpu.memory_space<vmem>>, vector<16x512xf32>,
    } else {
    }
    return
  }
  func.func @transform_0(%arg0: i32) -> (i32, i32, i32) {
    %c0_i32 = arith.constant 0 : i32
    %c0_i32_0 = arith.constant 0 : i32
    %c0_i32_1 = arith.constant 0 : i32
    return %arg0, %c0_i32, %c0_i32_0 : i32, i32, i32
  }
  func.func @transform_1(%arg0: i32) -> (i32, i32, i32) {
    %c0_i32 = arith.constant 0 : i32
    %c0_i32_0 = arith.constant 0 : i32
    %c0_i32_1 = arith.constant 0 : i32
    return %arg0, %c0_i32, %c0_i32_0 : i32, i32, i32
  }
  func.func @transform_2(%arg0: i32) -> (i32, i32) {
    %c0_i32 = arith.constant 0 : i32
    %c0_i32_0 = arith.constant 0 : i32
    %c0_i32_1 = arith.constant 0 : i32
    return %c0_i32, %c0_i32_0 : i32, i32
  }
  func.func @transform_3(%arg0: i32) -> (i32, i32) {
    %c0_i32 = arith.constant 0 : i32
    %c0_i32_0 = arith.constant 0 : i32
    %c0_i32_1 = arith.constant 0 : i32
    return %c0_i32, %c0_i32_0 : i32, i32
  }
}

</mosaic_0001>

<bundles_post_ra>
// kernel: dice_loss.1
= control target key start
LH: loop header
LB: loop body
LE: loop exit
PB: predicated region body
PF: predicated region fallthrough
CT: control target
= control target key end

     0   :  { %s376_s0 = inlined_call_operand.vmem [shape: f32[1,16,512], index: 0, kind: input, shape index: {}]   ;;  %s377_s1 = inlined_call_operand.vmem [shape: f32[1,16,512], index: 1, kind: input, shape index: {}]   ;;  %s378_s2 = inlined_call_operand.vmem [shape: f32[16,512], index: 2, kind: output, shape index: {0}]   ;;  %s379_s3 = inlined_call_operand.vmem [shape: f32[16,512], index: 3, kind: output, shape index: {1}]  }
   0x1   :  { %v33_v0 = vld [vmem:[%s376_s0] sm:$0xff]  ;;  %v34_v1 = vld [vmem:[%s376_s0 + $0x8] sm:$0xff]  ;;  %v35_v4 = vld [vmem:[%s376_s0 + $0x10] sm:$0xff] }
   0x2   :  { %v220_v2 = vmul.f32 -1.442695, %v33_v0  ;;  %v221_v3 = vmul.f32 -1.442695, %v34_v1  ;;  %v222_v5 = vmul.f32 -1.442695, %v35_v4 }
   0x3   :  { %v36_v6 = vld [vmem:[%s376_s0 + $0x18] sm:$0xff]  ;;  %v37_v8 = vld [vmem:[%s376_s0 + $0x20] sm:$0xff]  ;;  %v38_v9 = vld [vmem:[%s376_s0 + $0x28] sm:$0xff] }
   0x4   :  { %228 = vpow2.f32 %v220_v2  ;;  %v223_v7 = vmul.f32 -1.442695, %v36_v6  ;;  %v224_v10 = vmul.f32 -1.442695, %v37_v8  ;;  %v225_v11 = vmul.f32 -1.442695, %v38_v9 }
   0x5   :  { %230 = vpow2.f32 %v221_v3  ;;  %v39_v12 = vld [vmem:[%s376_s0 + $0x30] sm:$0xff]  ;;  %v40_v14 = vld [vmem:[%s376_s0 + $0x38] sm:$0xff]  ;;  %v89_v32 = vld [vmem:[%s377_s1] sm:$0xff] }
   0x6   :  { %232 = vpow2.f32 %v222_v5  ;;  %v226_v13 = vmul.f32 -1.442695, %v39_v12  ;;  %v227_v15 = vmul.f32 -1.442695, %v40_v14  ;;  %v90_v33 = vld [vmem:[%s377_s1 + $0x8] sm:$0xff]  ;;  %v91_v35 = vld [vmem:[%s377_s1 + $0x10] sm:$0xff] }
   0x7   :  { %234 = vpow2.f32 %v223_v7  ;;  %v92_v38 = vld [vmem:[%s377_s1 + $0x18] sm:$0xff]  ;;  %v93_v42 = vld [vmem:[%s377_s1 + $0x20] sm:$0xff]  ;;  %v94_v46 = vld [vmem:[%s377_s1 + $0x28] sm:$0xff] }
   0x8   :  { %236 = vpow2.f32 %v224_v10  ;;  %v95_v50 = vld [vmem:[%s377_s1 + $0x30] sm:$0xff]  ;;  %v96_v54 = vld [vmem:[%s377_s1 + $0x38] sm:$0xff] }
   0x9   :  { %238 = vpow2.f32 %v225_v11 }
   0xa   :  { %240 = vpow2.f32 %v226_v13 }
   0xb   :  { %242 = vpow2.f32 %v227_v15 }
   0xe   :  { %v229_v16 = vpop.eup %228 }
   0xf   :  { %v231_v17 = vpop.eup %230  ;;  %v65_v18 = vadd.f32 1.0, %v229_v16 }
  0x10   :  { %v233_v19 = vpop.eup %232  ;;  %v66_v20 = vadd.f32 1.0, %v231_v17 }
  0x11   :  { %v235_v21 = vpop.eup %234  ;;  %244 = vrcp.f32 %v65_v18  ;;  %v67_v22 = vadd.f32 1.0, %v233_v19 }
  0x12   :  { %v237_v23 = vpop.eup %236  ;;  %246 = vrcp.f32 %v66_v20  ;;  %v68_v24 = vadd.f32 1.0, %v235_v21 }
  0x13   :  { %v239_v25 = vpop.eup %238  ;;  %248 = vrcp.f32 %v67_v22  ;;  %v69_v26 = vadd.f32 1.0, %v237_v23 }
  0x14   :  { %v241_v27 = vpop.eup %240  ;;  %250 = vrcp.f32 %v68_v24  ;;  %v70_v28 = vadd.f32 1.0, %v239_v25 }
  0x15   :  { %v243_v29 = vpop.eup %242  ;;  %252 = vrcp.f32 %v69_v26  ;;  %v71_v30 = vadd.f32 1.0, %v241_v27 }
  0x16   :  { %254 = vrcp.f32 %v70_v28  ;;  %v72_v31 = vadd.f32 1.0, %v243_v29 }
  0x17   :  { %256 = vrcp.f32 %v71_v30 }
  0x18   :  { %258 = vrcp.f32 %v72_v31 }
  0x1b   :  { %v245_v34 = vpop.eup %244 }
  0x1c   :  { %v247_v36 = vpop.eup %246  ;;  %v97_v37 = vmul.f32 %v245_v34, %v89_v32  ;;  %v113_v39 = vadd.f32 %v245_v34, %v89_v32 }
  0x1d   :  { %v249_v40 = vpop.eup %248  ;;  %v98_v41 = vmul.f32 %v247_v36, %v90_v33  ;;  %v114_v43 = vadd.f32 %v247_v36, %v90_v33 }
  0x1e   :  { %v251_v44 = vpop.eup %250  ;;  %188 = vst [vmem:[%s378_s2] sm:$0xff] %v97_v37  ;;  %v99_v45 = vmul.f32 %v249_v40, %v91_v35  ;;  %204 = vst [vmem:[%s379_s3] sm:$0xff] %v113_v39  ;;  %v115_v47 = vadd.f32 %v249_v40, %v91_v35 }
  0x1f   :  { %v253_v48 = vpop.eup %252  ;;  %189 = vst [vmem:[%s378_s2 + $0x8] sm:$0xff] %v98_v41  ;;  %v100_v49 = vmul.f32 %v251_v44, %v92_v38  ;;  %205 = vst [vmem:[%s379_s3 + $0x8] sm:$0xff] %v114_v43  ;;  %v116_v51 = vadd.f32 %v251_v44, %v92_v38 }
  0x20   :  { %v255_v52 = vpop.eup %254  ;;  %190 = vst [vmem:[%s378_s2 + $0x10] sm:$0xff] %v99_v45  ;;  %v101_v53 = vmul.f32 %v253_v48, %v93_v42  ;;  %206 = vst [vmem:[%s379_s3 + $0x10] sm:$0xff] %v115_v47  ;;  %v117_v55 = vadd.f32 %v253_v48, %v93_v42 }
  0x21   :  { %v257_v56 = vpop.eup %256  ;;  %191 = vst [vmem:[%s378_s2 + $0x18] sm:$0xff] %v100_v49  ;;  %v102_v57 = vmul.f32 %v255_v52, %v94_v46  ;;  %207 = vst [vmem:[%s379_s3 + $0x18] sm:$0xff] %v116_v51  ;;  %v118_v58 = vadd.f32 %v255_v52, %v94_v46 }
  0x22   :  { %v259_v59 = vpop.eup %258  ;;  %192 = vst [vmem:[%s378_s2 + $0x20] sm:$0xff] %v101_v53  ;;  %v103_v60 = vmul.f32 %v257_v56, %v95_v50  ;;  %208 = vst [vmem:[%s379_s3 + $0x20] sm:$0xff] %v117_v55  ;;  %v119_v61 = vadd.f32 %v257_v56, %v95_v50 }
  0x23   :  { %193 = vst [vmem:[%s378_s2 + $0x28] sm:$0xff] %v102_v57  ;;  %v104_v62 = vmul.f32 %v259_v59, %v96_v54  ;;  %209 = vst [vmem:[%s379_s3 + $0x28] sm:$0xff] %v118_v58  ;;  %v120_v63 = vadd.f32 %v259_v59, %v96_v54 }
  0x24   :  { %194 = vst [vmem:[%s378_s2 + $0x30] sm:$0xff] %v103_v60  ;;  %210 = vst [vmem:[%s379_s3 + $0x30] sm:$0xff] %v119_v61 }
  0x25   :  { %195 = vst [vmem:[%s378_s2 + $0x38] sm:$0xff] %v104_v62  ;;  %211 = vst [vmem:[%s379_s3 + $0x38] sm:$0xff] %v120_v63 }

</bundles_post_ra>
